<compile_context>
chip_gen: v6e
topology: v6e:2x2x1
jax: 0.10.0
libtpu: 0.0.40
codegen_flags: <defaults>
</compile_context>

<pallas_src>
from functools import partial

import jax
import jax.numpy as jnp
from jax.experimental import pallas as pl
from jax.experimental.pallas import tpu as pltpu

NUM_POINTS = 3  # num_points of the adaptive piecewise activation


def policy_kernel(slope_ref, icpt_ref, pos_ref,               # SMEM: segment lines
                  zsT_ref, w1_ref, b1_ref, w2_ref, b2_ref,    # VMEM inputs (transposed layout)
                  out_ref):                                   # VMEM output (2, action_dim, block_b)
    # hidden layer: (hdim, zs_dim) @ (zs_dim, block_b) -> (hdim, block_b); f32 accumulate on MXU
    h = jnp.dot(w1_ref[...], zsT_ref[...], preferred_element_type=jnp.float32)
    h = h + b1_ref[...]                                # b1: (hdim, 1) broadcast over lanes

    # adaptive piecewise-linear activation (full-width VPU, precomputed lines):
    #   segment i: y = icpt[i] + slope[i] * h, selected by h >= pos[i]
    y = icpt_ref[0] + slope_ref[0] * h
    for i in range(1, NUM_POINTS - 1):
        y = jnp.where(h >= pos_ref[i], icpt_ref[i] + slope_ref[i] * h, y)

    # output layer: (action_dim, hdim) @ (hdim, block_b) -> (action_dim, block_b)
    a = y.astype(w2_ref.dtype)
    pre = jnp.dot(w2_ref[...], a, preferred_element_type=jnp.float32) + b2_ref[...]

    out_ref[0] = jnp.tanh(pre)   # action   (discrete=False -> torch.tanh)
    out_ref[1] = pre             # pre_activ
    # TODO(synk): discrete=True path uses F.gumbel_softmax (needs RNG); not implemented here.


def _pick_block_b(B, max_block=1024):
    """Full batch when small (single grid step); otherwise lane-aligned tiles so
    the grid has >=2 steps (keeps both v7x TensorCores busy)."""
    if B <= max_block:
        return B
    for bb in (1024, 512, 256, 128):
        if B % bb == 0:
            return bb
    return B


def policy_forward(zs, params, *, block_b=None, matmul_dtype=jnp.bfloat16):
    """Fused Policy forward.  zs: (B, zs_dim) f32.
    Returns (action, pre_activ), each (B, action_dim) f32."""
    B, zs_dim = zs.shape
    hdim = params["w1"].shape[1]
    action_dim = params["w2"].shape[1]

    if block_b is None:
        block_b = _pick_block_b(B)
    assert B % block_b == 0, (B, block_b)
    grid = (B // block_b,)

    # ---- layout plumbing (wrapper-side): batch -> lanes, features -> sublanes ----
    zsT = zs.T.astype(matmul_dtype)                      # (zs_dim, B)
    w1T = params["w1"].T.astype(matmul_dtype)            # (hdim, zs_dim)
    w2T = params["w2"].T.astype(matmul_dtype)            # (action_dim, hdim)
    b1 = params["b1"].reshape(hdim, 1).astype(jnp.float32)
    b2 = params["b2"].reshape(action_dim, 1).astype(jnp.float32)

    # ---- precompute piecewise segment lines (SMEM scalars) ----
    pos = params["pos"].astype(jnp.float32)              # (NUM_POINTS,)
    val = params["val"].astype(jnp.float32)              # (NUM_POINTS,)
    slope = (val[1:] - val[:-1]) / (pos[1:] - pos[:-1])  # (NUM_POINTS-1,)
    icpt = val[:-1] - slope * pos[:-1]                   # (NUM_POINTS-1,)

    out = pl.pallas_call(
        policy_kernel,
        out_shape=jax.ShapeDtypeStruct((2, action_dim, B), jnp.float32),
        grid=grid,
        in_specs=[
            pl.BlockSpec(memory_space=pltpu.MemorySpace.SMEM),            # slope
            pl.BlockSpec(memory_space=pltpu.MemorySpace.SMEM),            # icpt
            pl.BlockSpec(memory_space=pltpu.MemorySpace.SMEM),            # pos
            pl.BlockSpec((zs_dim, block_b), lambda i: (0, i)),            # zs^T tile (lane = batch)
            pl.BlockSpec((hdim, zs_dim), lambda i: (0, 0)),               # W1^T (resident)
            pl.BlockSpec((hdim, 1), lambda i: (0, 0)),                    # b1
            pl.BlockSpec((action_dim, hdim), lambda i: (0, 0)),           # W2^T (resident)
            pl.BlockSpec((action_dim, 1), lambda i: (0, 0)),              # b2
        ],
        out_specs=pl.BlockSpec((2, action_dim, block_b), lambda i: (0, 0, i)),  # fused output
        compiler_params=pltpu.CompilerParams(dimension_semantics=("parallel",)),
    )(slope, icpt, pos, zsT, w1T, b1, w2T, b2)

    action = out[0].T         # (B, action_dim)
    pre_activ = out[1].T      # (B, action_dim)
    return action, pre_activ


def make_params(key, zs_dim, hdim, action_dim, position_range=(-1.0, 1.0)):
    """PyTorch-equivalent parameters: Linear weights (in, out), 1-D biases,
    adaptive-activation control points (positions uniform in position_range,
    values = relu(position) for activ='relu')."""
    k1, k2, k3, k4 = jax.random.split(key, 4)
    w1 = jax.random.normal(k1, (zs_dim, hdim), jnp.float32) * (1.0 / jnp.sqrt(zs_dim))
    b1 = jax.random.normal(k2, (hdim,), jnp.float32) * 0.01
    w2 = jax.random.normal(k3, (hdim, action_dim), jnp.float32) * (1.0 / jnp.sqrt(hdim))
    b2 = jax.random.normal(k4, (action_dim,), jnp.float32) * 0.01
    pos = jnp.linspace(position_range[0], position_range[1], NUM_POINTS).astype(jnp.float32)
    val = jnp.maximum(pos, 0.0)
    return {"w1": w1, "b1": b1, "w2": w2, "b2": b2, "pos": pos, "val": val}


def policy_forward_ref(zs, params):
    """Pure-JAX f32 reference for validation."""
    h = zs @ params["w1"] + params["b1"][None, :]
    pos, val = params["pos"], params["val"]
    slopes = (val[1:] - val[:-1]) / (pos[1:] - pos[:-1])
    y = val[0] + slopes[0] * (h - pos[0])
    for i in range(1, NUM_POINTS - 1):
        y = jnp.where(h >= pos[i], val[i] + slopes[i] * (h - pos[i]), y)
    pre = y @ params["w2"] + params["b2"][None, :]
    return jnp.tanh(pre), pre


if __name__ == "__main__":
    # small shapes consistent with the module (scale_factor=1.0, discrete=False)
    B, ZS_DIM, HDIM, ACTION_DIM = 16, 32, 32, 8

    key = jax.random.PRNGKey(0)
    kz, kp = jax.random.split(key)
    zs = jax.random.normal(kz, (B, ZS_DIM), jnp.float32)
    params = make_params(kp, ZS_DIM, HDIM, ACTION_DIM)
    # small perturbation of control-point values so every piecewise segment is exercised
    params["val"] = params["val"] + 0.1 * jax.random.normal(
        jax.random.PRNGKey(1), (NUM_POINTS,), jnp.float32)

    action_ref, pre_ref = policy_forward_ref(zs, params)

    # exact-f32 matmul path: tight check
    action32, pre32 = policy_forward(zs, params, matmul_dtype=jnp.float32)
    action32 = jax.block_until_ready(action32)
    pre32 = jax.block_until_ready(pre32)
    assert jnp.allclose(pre32, pre_ref, atol=1e-4, rtol=1e-4)
    assert jnp.allclose(action32, action_ref, atol=1e-4, rtol=1e-4)

    # default bf16 matmul-operand path (v6e/v7x): f32 accumulation, loose check
    action_bf, pre_bf = policy_forward(zs, params, matmul_dtype=jnp.bfloat16)
    action_bf = jax.block_until_ready(action_bf)
    pre_bf = jax.block_until_ready(pre_bf)
    assert jnp.allclose(pre_bf, pre_ref, atol=5e-2, rtol=5e-2)
    assert jnp.allclose(action_bf, action_ref, atol=5e-2, rtol=5e-2)

    print("KERNEL_OK")
</pallas_src>

<mosaic_0001>
module attributes {stable_mosaic.version = 11 : i64} {
  func.func @policy_kernel(%arg0: i32, %arg1: memref<2xf32, #tpu.memory_space<smem>>, %arg2: memref<2xf32, #tpu.memory_space<smem>>, %arg3: memref<3xf32, #tpu.memory_space<smem>>, %arg4: memref<32x16xf32, #tpu.memory_space<vmem>>, %arg5: memref<32x32xf32, #tpu.memory_space<vmem>>, %arg6: memref<32x1xf32, #tpu.memory_space<vmem>>, %arg7: memref<8x32xf32, #tpu.memory_space<vmem>>, %arg8: memref<8x1xf32, #tpu.memory_space<vmem>>, %arg9: memref<2x8x16xf32, #tpu.memory_space<vmem>>) attributes {dimension_semantics = [#tpu.dimension_semantics<parallel>], iteration_bounds = array<i64: 1>, scalar_prefetch = 0 : i64, scratch_operands = 0 : i64, tpu.core_type = #tpu.core_type<tc>, window_params = [{transform_indices = @transform_0, window_bounds = array<i64: 2>}, {transform_indices = @transform_1, window_bounds = array<i64: 2>}, {transform_indices = @transform_2, window_bounds = array<i64: 3>}, {transform_indices = @transform_3, window_bounds = array<i64: 32, 16>}, {pipeline_mode = #tpu.pipeline_mode<synchronous>, transform_indices = @transform_4, window_bounds = array<i64: 32, 32>}, {pipeline_mode = #tpu.pipeline_mode<synchronous>, transform_indices = @transform_5, window_bounds = array<i64: 32, 1>}, {pipeline_mode = #tpu.pipeline_mode<synchronous>, transform_indices = @transform_6, window_bounds = array<i64: 8, 32>}, {pipeline_mode = #tpu.pipeline_mode<synchronous>, transform_indices = @transform_7, window_bounds = array<i64: 8, 1>}, {transform_indices = @transform_8, window_bounds = array<i64: 2, 8, 16>}]} {
    %c0 = arith.constant 0 : index
    %c0_0 = arith.constant 0 : index
    %0 = vector.load %arg5[%c0, %c0_0] : memref<32x32xf32, #tpu.memory_space<vmem>>, vector<32x32xf32>
    %c0_1 = arith.constant 0 : index
    %c0_2 = arith.constant 0 : index
    %1 = vector.load %arg4[%c0_1, %c0_2] : memref<32x16xf32, #tpu.memory_space<vmem>>, vector<32x16xf32>
    %cst = arith.constant dense<0.000000e+00> : vector<32x16xf32>
    %2 = tpu.matmul %0, %1, %cst {dimension_numbers = #tpu.dot_dimension_numbers<[1], [0], [0], [1], [0, 0, 1, 1], [], []>} : vector<32x32xf32>, vector<32x16xf32>, vector<32x16xf32> -> vector<32x16xf32>
    %c0_3 = arith.constant 0 : index
    %c0_4 = arith.constant 0 : index
    %3 = vector.load %arg6[%c0_3, %c0_4] : memref<32x1xf32, #tpu.memory_space<vmem>>, vector<32x1xf32>
    %4 = vector.broadcast %3 : vector<32x1xf32> to vector<32x16xf32>
    %5 = arith.addf %2, %4 : vector<32x16xf32>
    %c0_5 = arith.constant 0 : index
    %6 = memref.load %arg2[%c0_5] : memref<2xf32, #tpu.memory_space<smem>>
    %c0_6 = arith.constant 0 : index
    %7 = memref.load %arg1[%c0_6] : memref<2xf32, #tpu.memory_space<smem>>
    %8 = vector.broadcast %7 : f32 to vector<32x16xf32>
    %9 = arith.mulf %8, %5 : vector<32x16xf32>
    %10 = vector.broadcast %6 : f32 to vector<32x16xf32>
    %11 = arith.addf %10, %9 : vector<32x16xf32>
    %c1 = arith.constant 1 : index
    %12 = memref.load %arg3[%c1] : memref<3xf32, #tpu.memory_space<smem>>
    %13 = vector.broadcast %12 : f32 to vector<32x16xf32>
    %14 = arith.cmpf oge, %5, %13 : vector<32x16xf32>
    %c1_7 = arith.constant 1 : index
    %15 = memref.load %arg2[%c1_7] : memref<2xf32, #tpu.memory_space<smem>>
    %c1_8 = arith.constant 1 : index
    %16 = memref.load %arg1[%c1_8] : memref<2xf32, #tpu.memory_space<smem>>
    %17 = vector.broadcast %16 : f32 to vector<32x16xf32>
    %18 = arith.mulf %17, %5 : vector<32x16xf32>
    %19 = vector.broadcast %15 : f32 to vector<32x16xf32>
    %20 = arith.addf %19, %18 : vector<32x16xf32>
    %21 = arith.select %14, %20, %11 : vector<32x16xi1>, vector<32x16xf32>
    %c0_9 = arith.constant 0 : index
    %c0_10 = arith.constant 0 : index
    %22 = vector.load %arg7[%c0_9, %c0_10] : memref<8x32xf32, #tpu.memory_space<vmem>>, vector<8x32xf32>
    %cst_11 = arith.constant dense<0.000000e+00> : vector<8x16xf32>
    %23 = tpu.matmul %22, %21, %cst_11 {dimension_numbers = #tpu.dot_dimension_numbers<[1], [0], [0], [1], [0, 0, 1, 1], [], []>} : vector<8x32xf32>, vector<32x16xf32>, vector<8x16xf32> -> vector<8x16xf32>
    %c0_12 = arith.constant 0 : index
    %c0_13 = arith.constant 0 : index
    %24 = vector.load %arg8[%c0_12, %c0_13] : memref<8x1xf32, #tpu.memory_space<vmem>>, vector<8x1xf32>
    %25 = vector.broadcast %24 : vector<8x1xf32> to vector<8x16xf32>
    %26 = arith.addf %23, %25 : vector<8x16xf32>
    %27 = math.tanh %26 : vector<8x16xf32>
    %c0_14 = arith.constant 0 : index
    %c0_15 = arith.constant 0 : index
    %c0_16 = arith.constant 0 : index
    %28 = vector.load %arg9[%c0_14, %c0_15, %c0_16] : memref<2x8x16xf32, #tpu.memory_space<vmem>>, vector<1x8x16xf32>
    %29 = vector.shape_cast %28 : vector<1x8x16xf32> to vector<8x16xf32>
    %30 = vector.shape_cast %27 : vector<8x16xf32> to vector<1x8x16xf32>
    tpu.vector_store %arg9[%c0_14, %c0_15, %c0_16], %30 {strides = array<i32>} : memref<2x8x16xf32, #tpu.memory_space<vmem>>, vector<1x8x16xf32>,
    %c1_17 = arith.constant 1 : index
    %c0_18 = arith.constant 0 : index
    %c0_19 = arith.constant 0 : index
    %31 = vector.load %arg9[%c1_17, %c0_18, %c0_19] : memref<2x8x16xf32, #tpu.memory_space<vmem>>, vector<1x8x16xf32>
    %32 = vector.shape_cast %31 : vector<1x8x16xf32> to vector<8x16xf32>
    %33 = vector.shape_cast %26 : vector<8x16xf32> to vector<1x8x16xf32>
    tpu.vector_store %arg9[%c1_17, %c0_18, %c0_19], %33 {strides = array<i32>} : memref<2x8x16xf32, #tpu.memory_space<vmem>>, vector<1x8x16xf32>,
    return
  }
  func.func @transform_0(%arg0: i32) -> i32 {
    %c0_i32 = arith.constant 0 : i32
    %c0_i32_0 = arith.constant 0 : i32
    return %c0_i32 : i32
  }
  func.func @transform_1(%arg0: i32) -> i32 {
    %c0_i32 = arith.constant 0 : i32
    %c0_i32_0 = arith.constant 0 : i32
    return %c0_i32 : i32
  }
  func.func @transform_2(%arg0: i32) -> i32 {
    %c0_i32 = arith.constant 0 : i32
    %c0_i32_0 = arith.constant 0 : i32
    return %c0_i32 : i32
  }
  func.func @transform_3(%arg0: i32) -> (i32, i32) {
    %c0_i32 = arith.constant 0 : i32
    %c0_i32_0 = arith.constant 0 : i32
    return %c0_i32, %arg0 : i32, i32
  }
  func.func @transform_4(%arg0: i32) -> (i32, i32) {
    %c0_i32 = arith.constant 0 : i32
    %c0_i32_0 = arith.constant 0 : i32
    %c0_i32_1 = arith.constant 0 : i32
    return %c0_i32, %c0_i32_0 : i32, i32
  }
  func.func @transform_5(%arg0: i32) -> (i32, i32) {
    %c0_i32 = arith.constant 0 : i32
    %c0_i32_0 = arith.constant 0 : i32
    %c0_i32_1 = arith.constant 0 : i32
    return %c0_i32, %c0_i32_0 : i32, i32
  }
  func.func @transform_6(%arg0: i32) -> (i32, i32) {
    %c0_i32 = arith.constant 0 : i32
    %c0_i32_0 = arith.constant 0 : i32
    %c0_i32_1 = arith.constant 0 : i32
    return %c0_i32, %c0_i32_0 : i32, i32
  }
  func.func @transform_7(%arg0: i32) -> (i32, i32) {
    %c0_i32 = arith.constant 0 : i32
    %c0_i32_0 = arith.constant 0 : i32
    %c0_i32_1 = arith.constant 0 : i32
    return %c0_i32, %c0_i32_0 : i32, i32
  }
  func.func @transform_8(%arg0: i32) -> (i32, i32, i32) {
    %c0_i32 = arith.constant 0 : i32
    %c0_i32_0 = arith.constant 0 : i32
    %c0_i32_1 = arith.constant 0 : i32
    return %c0_i32, %c0_i32_0, %arg0 : i32, i32, i32
  }
}

</mosaic_0001>

<bundles_post_ra>
// kernel: tpu_custom_call.1
= control target key start
LH: loop header
LB: loop body
LE: loop exit
PB: predicated region body
PF: predicated region fallthrough
CT: control target
= control target key end

     0   :  { %13 = vsyncpa [#allocation4], 0  ;;  %s567_s0 = inlined_call_operand.vmem [shape: f32[2], index: 0, kind: input, shape index: {}]   ;;  %s568_s1 = inlined_call_operand.vmem [shape: f32[2], index: 1, kind: input, shape index: {}]   ;;  %s569_s2 = inlined_call_operand.vmem [shape: f32[3], index: 2, kind: input, shape index: {}]   ;;  %s570_s3 = inlined_call_operand.vmem [shape: f32[32,16], index: 3, kind: input, shape index: {}]   ;;  %s571_s4 = inlined_call_operand.vmem [shape: f32[32,32], index: 4, kind: input, shape index: {}]   ;;  %s572_s5 = inlined_call_operand.vmem [shape: f32[32,1], index: 5, kind: input, shape index: {}]   ;;  %s573_s6 = inlined_call_operand.vmem [shape: f32[8,32], index: 6, kind: input, shape index: {}]   ;;  %s574_s7 = inlined_call_operand.vmem [shape: f32[8,1], index: 7, kind: input, shape index: {}]   ;;  %s575_s8 = inlined_call_operand.hbm [shape: f32[2,8,16], index: 8, kind: output, shape index: {}]  }
   0x1   :  { %14 = vsyncpa [#allocation6], 0  ;;  %s32_s29 = sshll.u32 %s568_s1, 4  ;;  %s33_s29 = int_to_ptr.vmem [resolvable:$true] %s32_s29 }
   0x2   :  { %15 = vsyncpa [#allocation3], 0  ;;  %s22_s10 = sshll.u32 %s567_s0, 4  ;;  %s392_s11 = scalar_lea.vmem %s33_s29, 16  ;;  %s23_s10 = int_to_ptr.vmem [resolvable:$true] %s22_s10 }
   0x3   :  { %p393_p0 = scmp.ne.s32.totalorder %s33_s29, %s392_s11  ;;  %p397_p1 = scmp.lt.s32.totalorder %s33_s29, %s33_s29 }
   0x4   :  { %p398_p2 = scmp.lt.s32.totalorder %s392_s11, %s392_s11 }
   0x6   :  { %p399_p3 = por %p398_p2, %p397_p1 }
   0x8   :  { %p400_p4 = pnand %p399_p3, %p393_p0 }
   0xa   :  { %403 = shalt.err (!%p400_p4)
}
   0xb   :  { %s454_s12 = smov [#allocation5]   ;;  %s404_s13 = scalar_lea.vmem %s23_s10, 16 }
   0xc   :  { %35 = dma.vmem_to_smem %s33_s29, 16, %s454_s12, [#allocation6]  }
   0xd   :  { %p405_p5 = scmp.ne.s32.totalorder %s23_s10, %s404_s13  ;;  %p409_p6 = scmp.lt.s32.totalorder %s23_s10, %s23_s10 }
   0xe   :  { %p410_p7 = scmp.lt.s32.totalorder %s404_s13, %s404_s13 }
  0x10   :  { %p411_p8 = por %p410_p7, %p409_p6 }
  0x12   :  { %p412_p9 = pnand %p411_p8, %p405_p5 }
  0x14   :  { %415 = shalt.err (!%p412_p9)
}
  0x15   :  { %s455_s1 = smov [#allocation2]   ;;  %s42_s15 = sshll.u32 %s569_s2, 4  ;;  %s43_s15 = int_to_ptr.vmem [resolvable:$true] %s42_s15 }
  0x16   :  { %25 = dma.vmem_to_smem %s23_s10, 16, %s455_s1, [#allocation4]  }
  0x17   :  { %s416_s16 = scalar_lea.vmem %s43_s15, 16  ;;  %p421_p11 = scmp.lt.s32.totalorder %s43_s15, %s43_s15 }
  0x18   :  { %p417_p10 = scmp.ne.s32.totalorder %s43_s15, %s416_s16  ;;  %p422_p12 = scmp.lt.s32.totalorder %s416_s16, %s416_s16 }
  0x1a   :  { %p423_p13 = por %p422_p12, %p421_p11 }
  0x1c   :  { %p424_p0 = pnand %p423_p13, %p417_p10 }
  0x1e   :  { %427 = shalt.err (!%p424_p0)
}
  0x1f   :  { %s456_s17 = smov [#allocation7]  }
  0x20   :  { %45 = dma.vmem_to_smem %s43_s15, 16, %s456_s17, [#allocation6]  }
  0x21   :  { %448 = dma.done.wait [#allocation4], 16  }
  0x22   :  { %449 = vsyncadd [#allocation4], 4294967280 }
  0x23   :  { %450 = dma.done.wait [#allocation6], 32  }
  0x24   :  { %451 = vsyncadd [#allocation6], 4294967264 }
  0x25   :  { %65 = sfence }
  0x26   :  { %v73_v0 = vld [vmem:[%s570_s3 + $0x18] sm:$0xff]  ;;  %v72_v1 = vld [vmem:[%s570_s3 + $0x10] sm:$0xff]  ;;  %vm98_vm0 = vcmask 261120   ;;  %v66_v2 = vld [vmem:[%s571_s4] sm:$0xff]  ;;  %v457_v3 = vmov 0   ;;  %v458_v14 = vmov 0.0  }
  0x27   :  { %354 = vmatprep.subr.mxu0 %v73_v0  ;;  %388 = vset.pattern.permute.xlu0 %v457_v3  ;;  %v71_v4 = vld [vmem:[%s570_s3 + $0x8] sm:$0xff]  ;;  %v77_v5 = vld [vmem:[%s572_s5 + $0x18] sm:$0xff]  ;;  %v70_v7 = vld [vmem:[%s570_s3] sm:$0xff]  ;;  %vm459_vm1 = vmmov 0   ;;  %s339_s18 = sld [smem:[#allocation2 + $0x1]]  ;;  %vm311_vm6 = vcmask 130048  }
  0x28   :  { %355 = vmatpush3.msra.mxu0 %v73_v0  ;;  %362 = vmatprep.mubr.msk.f32.mxu0 %vm98_vm0, %v66_v2  ;;  %v75_v6 = vld [vmem:[%s572_s5 + $0x8] sm:$0xff]  ;;  %v76_v8 = vld [vmem:[%s572_s5 + $0x10] sm:$0xff]  ;;  %v74_v10 = vld [vmem:[%s572_s5] sm:$0xff]  ;;  %s197_s5 = sld [smem:[#allocation2]]  ;;  %s460_s21 = smov [#allocation8]  }
  0x29   :  { %356 = vmatprep.subr.mxu0 %v72_v1  ;;  %95 = vperm.xlu0 %388, %v77_v5   ;;  %v67_v9 = vld [vmem:[%s571_s4 + $0x8] sm:$0xff]  ;;  %v68_v11 = vld [vmem:[%s571_s4 + $0x10] sm:$0xff]  ;;  %v231_v12 = vld [vmem:[%s574_s7] sm:$0xff]  ;;  %s196_s7 = sld [smem:[#allocation5]]  ;;  %s320_s22 = sshll.u32 %s460_s21, 4  ;;  %s321_s22 = int_to_ptr.vmem [resolvable:$true] %s320_s22 }
  0x2a   :  { %357 = vmatpush3.msra.mxu0 %v72_v1  ;;  %389 = vset.pattern.permute.xlu1 %v457_v3  ;;  %v69_v13 = vld [vmem:[%s571_s4 + $0x18] sm:$0xff]  ;;  %s337_s19 = sld [smem:[#allocation7 + $0x1]]  ;;  %v230_v51 = vld [vmem:[%s573_s6] sm:$0xff]  ;;  %s428_s23 = scalar_lea.vmem %s321_s22, 256 }
  0x2b   :  { %358 = vmatprep.subr.mxu0 %v71_v4  ;;  %85 = vperm.xlu1 %389, %v75_v6   ;;  %s338_s2 = sld [smem:[#allocation5 + $0x1]]  ;;  %p429_p1 = scmp.ne.s32.totalorder %s321_s22, %s428_s23 }
  0x2c   :  { %359 = vmatpush3.msra.mxu0 %v71_v4  ;;  %368 = vmatprep.subr.mxu1 %v458_v14  ;;  %p433_p2 = scmp.lt.s32.totalorder %s321_s22, %s321_s22  ;;  %p434_p3 = scmp.lt.s32.totalorder %s428_s23, %s428_s23 }
  0x2d   :  { %360 = vmatprep.subr.mxu0 %v70_v7  ;;  %90 = vperm.xlu0 %388, %v76_v8   ;;  %v216_v22 = vstv %s339_s18 }
  0x2e   :  { %361 = vmatpush3.msra.mxu0 %v70_v7  ;;  %376 = vmatprep.mubr.msk.f32.mxu1 %vm459_vm1, %v458_v14  ;;  %v198_v21 = vstv %s197_s5  ;;  %p435_p4 = por %p434_p3, %p433_p2 }
  0x2f   :  { %363 = vmatmul.mubr.msk.f32.vlgmr.msra.gmra.mxu0 %vm98_vm0, %v67_v9  ;;  %80 = vperm.xlu1 %389, %v74_v10   ;;  %v203_v29 = vstv %s196_s7 }
  0x30   :  { %365 = vmatprep.mubr.msk.f32.mxu0 %vm98_vm0, %v68_v11  ;;  %v209_v36 = vstv %s337_s19  ;;  %p436_p5 = pnand %p435_p4, %p429_p1 }
  0x31   :  { %234 = vperm.xlu0 %388, %v231_v12   ;;  %v221_v37 = vstv %s338_s2 }
  0x33   :  { %366 = vmatmul.mubr.msk.f32.gmra.mxu0 %vm98_vm0, %v69_v13 }
  0xa4   :  { %v96_v16 = vpop.permute.xlu0 %95 }
  0xa6   :  { %v86_v15 = vpop.permute.xlu1 %85 }
  0xa8   :  { %v91_v26 = vpop.permute.xlu0 %90 }
  0xaa   :  { %v81_v18 = vpop.permute.xlu1 %80 }
  0xac   :  { %v235_v53 = vpop.permute.xlu0 %234 }
  0xef   :  { %v364_v17 = vpop.f32.mrf.mxu0 }
  0xf0   :  { %v183_v19 = vadd.f32 %v364_v17, %v86_v15 }
  0xf1   :  { %v177_v20 = vpop.f32.mrf.mxu0 }
  0xf2   :  { %v178_v23 = vadd.f32 %v177_v20, %v81_v18  ;;  %v200_v27 = vmul.f32 %v198_v21, %v183_v19  ;;  %v218_v30 = vmul.f32 %v216_v22, %v183_v19  ;;  %vm211_vm4 = vcmp.ge.f32.partialorder %v183_v19, %v209_v36 }
  0xf3   :  { %v367_v24 = vpop.f32.mrf.mxu0 }
  0xf4   :  { %v193_v25 = vadd.f32 %v367_v24, %v96_v16  ;;  %v199_v34 = vmul.f32 %v198_v21, %v178_v23  ;;  %v217_v35 = vmul.f32 %v216_v22, %v178_v23  ;;  %v205_v42 = vadd.f32 %v203_v29, %v200_v27 }
  0xf5   :  { %v187_v28 = vpop.f32.mrf.mxu0  ;;  %v223_v46 = vadd.f32 %v221_v37, %v218_v30  ;;  %vm210_vm5 = vcmp.ge.f32.partialorder %v178_v23, %v209_v36 }
  0xf6   :  { %v202_v31 = vmul.f32 %v198_v21, %v193_v25  ;;  %v220_v32 = vmul.f32 %v216_v22, %v193_v25  ;;  %v188_v33 = vadd.f32 %v187_v28, %v91_v26  ;;  %vm213_vm2 = vcmp.ge.f32.partialorder %v193_v25, %v209_v36 }
  0xf7   :  { %v204_v48 = vadd.f32 %v203_v29, %v199_v34  ;;  %v222_v49 = vadd.f32 %v221_v37, %v217_v35  ;;  %v227_v50 = vsel %vm211_vm4, %v223_v46, %v205_v42 }
  0xf8   :  { %v201_v38 = vmul.f32 %v198_v21, %v188_v33  ;;  %v219_v39 = vmul.f32 %v216_v22, %v188_v33  ;;  %v207_v40 = vadd.f32 %v203_v29, %v202_v31  ;;  %v225_v41 = vadd.f32 %v221_v37, %v220_v32 }
  0xf9   :  { %vm212_vm3 = vcmp.ge.f32.partialorder %v188_v33, %v209_v36  ;;  %v226_v52 = vsel %vm210_vm5, %v222_v49, %v204_v48 }
  0xfa   :  { %v229_v43 = vsel %vm213_vm2, %v225_v41, %v207_v40  ;;  %v206_v44 = vadd.f32 %v203_v29, %v201_v38  ;;  %v224_v45 = vadd.f32 %v221_v37, %v219_v39 }
  0xfb   :  { %369 = vmatpush3.msra.mxu1 %v229_v43 }
  0xfc   :  { %370 = vmatprep.subr.mxu1 %v458_v14  ;;  %v228_v47 = vsel %vm212_vm3, %v224_v45, %v206_v44 }
  0xfd   :  { %371 = vmatpush3.msra.mxu1 %v228_v47 }
  0xfe   :  { %372 = vmatprep.subr.mxu1 %v458_v14 }
  0xff   :  { %373 = vmatpush3.msra.mxu1 %v227_v50 }
 0x100   :  { %374 = vmatprep.subr.mxu1 %v458_v14 }
 0x101   :  { %375 = vmatpush3.msra.mxu1 %v226_v52 }
 0x102   :  { %377 = vmatmul.mubr.msk.f32.vlgmr.msra.gmra.mxu1 %vm98_vm0, %v230_v51 }
 0x1c2   :  { %v306_v54 = vpop.f32.mrf.mxu1 }
 0x1c3   :  { %v307_v55 = vadd.f32 %v306_v54, %v235_v53 }
 0x1c4   :  { %v378_v56 = vpop.f32.mrf.mxu1 }
 0x1c5   :  { %390 = vtanh.f32 %v307_v55  ;;  %314 = vst.msk [vmem:[#allocation8 + $0x8] sm:$0xff] %vm311_vm6, %v307_v55 }
 0x1d2   :  { %v391_v57 = vpop.eup %390 }
 0x1d3   :  { %312 = vst.msk [vmem:[#allocation8] sm:$0xff] %vm311_vm6, %v391_v57 }
 0x1d4   :  { %439 = shalt.err (!%p436_p5)
}
 0x1d5   :  { %s461_s6 = smov 128   ;;  %s462_s24 = smov 8  }
 0x1d6   :  { %326 = dma.vmem_to_hbm [thread:$0]  %s321_s22, 256, %s575_s8, [#allocation3], %s461_s6, %s461_s6, %s462_s24  }
 0x1d7   :  { %452 = dma.done.wait [#allocation3], 256  }
 0x1d8   :  { %453 = vsyncadd [#allocation3], 4294967040 }
 0x1d9   :  { %330 = vsyncpa [#allocation3], 1 }
 0x1da   :  { %331 = vsyncpa [#allocation4], 1 }
 0x1db   :  { %332 = vsyncpa [#allocation6], 1 }

</bundles_post_ra>
